<compile_context>
chip_gen: v7x
topology: tpu7x:2x2x1
jax: 0.10.0
libtpu: 0.0.40
codegen_flags: <defaults>
</compile_context>

<pallas_src>
import jax
import jax.numpy as jnp
from jax.experimental import pallas as pl
from jax.experimental.pallas import tpu as pltpu

LANE = 128
TM_MAX = 4096  # per-step lane-axis tile for the large-M path (review: 2048-4096)


def _round_up(x, m):
    return ((x + m - 1) // m) * m


def _make_conv_clamp_kernel(lo, hi):
    """out = clamp(W @ P + b, lo, hi) with lane-dense (Cout, TM) tiles."""
    def kernel(w_ref, p_ref, b_ref, o_ref):
        acc = jnp.dot(w_ref[...], p_ref[...], preferred_element_type=jnp.float32)
        acc = acc + b_ref[...]            # (Cout, TM) + (Cout, 1) lane-broadcast
        acc = jnp.maximum(acc, lo)        # clamp_min
        acc = jnp.minimum(acc, hi)        # clamp_max
        o_ref[...] = acc.astype(o_ref.dtype)
    return kernel


def conv2d_clamp(x, weight, bias, *, stride, padding, min_clamp=0.0, max_clamp=0.9):
    """x: (N, Cin, H, W) f32; weight: (Cout, Cin, KH, KW); bias: (Cout,)."""
    N, Cin, H, W = x.shape
    Cout, _, KH, KW = weight.shape
    s, p = stride, padding
    lo, hi = float(min_clamp), float(max_clamp)

    OH = (H + 2 * p - KH) // s + 1
    OW = (W + 2 * p - KW) // s + 1
    OHW = OH * OW
    K = Cin * KH * KW

    # Zero padding (PyTorch Conv2d default padding_mode='zeros').  Pad-only
    # windows become zero im2col columns and yield exactly clamp(bias) from the
    # matmul + bias + clamp, so no special-casing of the boundary is needed.
    xp = jnp.pad(x, ((0, 0), (0, 0), (p, p), (p, p)))

    # Full-output im2col, per-batch layout P[n, k, m] with
    #   k = (cin, kh, kw) row-major  (matches weight.reshape(Cout, K))
    #   m = (oh, ow)      row-major
    wins = []
    for kh in range(KH):
        for kw in range(KW):
            wins.append(xp[:, :,
                            kh:kh + s * (OH - 1) + 1:s,
                            kw:kw + s * (OW - 1) + 1:s])   # (N, Cin, OH, OW)
    P = jnp.stack(wins, axis=2).reshape(N, K, OHW).astype(jnp.float32)

    w2 = weight.reshape(Cout, K).astype(jnp.float32)   # (Cout, K)
    b2 = bias.reshape(Cout, 1).astype(jnp.float32)     # (Cout, 1)

    # Tiling of the flattened-spatial (lane) axis.
    if OHW <= TM_MAX:
        TM = OHW                      # full-extent block: no lane padding needed
        OHW_pad = OHW
    else:
        TM = TM_MAX                   # lane-aligned big tiles, pipelined DMA
        OHW_pad = _round_up(OHW, TM)
        P = jnp.pad(P, ((0, 0), (0, 0), (0, OHW_pad - OHW)))
    m_tiles = OHW_pad // TM

    kernel = _make_conv_clamp_kernel(lo, hi)

    out = pl.pallas_call(
        kernel,
        out_shape=jax.ShapeDtypeStruct((N, Cout, OHW_pad), jnp.float32),
        grid=(N, m_tiles),
        in_specs=[
            pl.BlockSpec((Cout, K), lambda n, j: (0, 0)),        # weights, resident
            pl.BlockSpec((None, K, TM), lambda n, j: (n, 0, j)),  # im2col tile
            pl.BlockSpec((Cout, 1), lambda n, j: (0, 0)),        # bias column
        ],
        out_specs=pl.BlockSpec((None, Cout, TM), lambda n, j: (n, 0, j)),
        compiler_params=pltpu.CompilerParams(
            dimension_semantics=("parallel", "parallel")),
    )(w2, P, b2)

    if OHW_pad != OHW:
        out = out[:, :, :OHW]
    return out.reshape(N, Cout, OH, OW)


conv2d_clamp_jit = jax.jit(
    conv2d_clamp,
    static_argnames=("stride", "padding", "min_clamp", "max_clamp"))


if __name__ == "__main__":
    key = jax.random.PRNGKey(0)
    kx, kwk, kbk = jax.random.split(key, 3)

    # Small shapes consistent with the module: Conv2d(4 -> 8, k=2, stride=3, pad=10)
    N, Cin, H, W = 2, 4, 16, 16
    Cout, KH, KW = 8, 2, 2
    stride, padding = 3, 10

    x = jax.random.normal(kx, (N, Cin, H, W), dtype=jnp.float32)
    fan_in = Cin * KH * KW
    bound = 1.0 / (fan_in ** 0.5)
    weight = jax.random.uniform(kwk, (Cout, Cin, KH, KW), jnp.float32, -bound, bound)
    bias = jax.random.uniform(kbk, (Cout,), jnp.float32, -bound, bound)

    out = conv2d_clamp_jit(x, weight, bias, stride=stride, padding=padding,
                           min_clamp=0.0, max_clamp=0.9)
    out = jax.block_until_ready(out)

    # Reference check with lax.conv (NCHW, OIHW) + bias + clamp.
    ref = jax.lax.conv_general_dilated(
        x, weight, window_strides=(stride, stride),
        padding=((padding, padding), (padding, padding)),
        dimension_numbers=("NCHW", "OIHW", "NCHW"))
    ref = jnp.clip(ref + bias.reshape(1, Cout, 1, 1), 0.0, 0.9)

    OH = (H + 2 * padding - KH) // stride + 1
    OW = (W + 2 * padding - KW) // stride + 1
    assert out.shape == (N, Cout, OH, OW)
    assert jnp.allclose(out, ref, atol=1e-5, rtol=1e-5)
    print("KERNEL_OK")
</pallas_src>

<mosaic_0001>
module attributes {stable_mosaic.version = 11 : i64} {
  func.func @kernel(%arg0: i32, %arg1: i32, %arg2: memref<8x16xf32, #tpu.memory_space<vmem>>, %arg3: memref<1x16x144xf32, #tpu.memory_space<vmem>>, %arg4: memref<8x1xf32, #tpu.memory_space<vmem>>, %arg5: memref<1x8x144xf32, #tpu.memory_space<vmem>>) attributes {dimension_semantics = [#tpu.dimension_semantics<parallel>, #tpu.dimension_semantics<parallel>], iteration_bounds = array<i64: 2, 1>, scalar_prefetch = 0 : i64, scratch_operands = 0 : i64, tpu.core_type = #tpu.core_type<tc>, window_params = [{pipeline_mode = #tpu.pipeline_mode<synchronous>, transform_indices = @transform_0, window_bounds = array<i64: 8, 16>}, {transform_indices = @transform_1, window_bounds = array<i64: 1, 16, 144>}, {pipeline_mode = #tpu.pipeline_mode<synchronous>, transform_indices = @transform_2, window_bounds = array<i64: 8, 1>}, {transform_indices = @transform_3, window_bounds = array<i64: 1, 8, 144>}]} {
    %c0 = arith.constant 0 : index
    %c0_0 = arith.constant 0 : index
    %0 = vector.load %arg2[%c0, %c0_0] : memref<8x16xf32, #tpu.memory_space<vmem>>, vector<8x16xf32>
    %c0_1 = arith.constant 0 : index
    %c0_2 = arith.constant 0 : index
    %c0_3 = arith.constant 0 : index
    %1 = vector.load %arg3[%c0_1, %c0_2, %c0_3] : memref<1x16x144xf32, #tpu.memory_space<vmem>>, vector<1x16x144xf32>
    %2 = vector.shape_cast %1 : vector<1x16x144xf32> to vector<16x144xf32>
    %cst = arith.constant dense<0.000000e+00> : vector<8x144xf32>
    %3 = tpu.matmul %0, %2, %cst {dimension_numbers = #tpu.dot_dimension_numbers<[1], [0], [0], [1], [0, 0, 1, 1], [], []>} : vector<8x16xf32>, vector<16x144xf32>, vector<8x144xf32> -> vector<8x144xf32>
    %c0_4 = arith.constant 0 : index
    %c0_5 = arith.constant 0 : index
    %4 = vector.load %arg4[%c0_4, %c0_5] : memref<8x1xf32, #tpu.memory_space<vmem>>, vector<8x1xf32>
    %5 = vector.broadcast %4 : vector<8x1xf32> to vector<8x144xf32>
    %6 = arith.addf %3, %5 : vector<8x144xf32>
    %cst_6 = arith.constant 0.000000e+00 : f32
    %7 = vector.broadcast %cst_6 : f32 to vector<8x144xf32>
    %8 = arith.maximumf %6, %7 : vector<8x144xf32>
    %cst_7 = arith.constant 0.899999976 : f32
    %9 = vector.broadcast %cst_7 : f32 to vector<8x144xf32>
    %10 = arith.minimumf %8, %9 : vector<8x144xf32>
    %c0_8 = arith.constant 0 : index
    %c0_9 = arith.constant 0 : index
    %c0_10 = arith.constant 0 : index
    %11 = vector.load %arg5[%c0_8, %c0_9, %c0_10] : memref<1x8x144xf32, #tpu.memory_space<vmem>>, vector<1x8x144xf32>
    %12 = vector.shape_cast %11 : vector<1x8x144xf32> to vector<8x144xf32>
    %13 = vector.shape_cast %10 : vector<8x144xf32> to vector<1x8x144xf32>
    tpu.vector_store %arg5[%c0_8, %c0_9, %c0_10], %13 {strides = array<i32>} : memref<1x8x144xf32, #tpu.memory_space<vmem>>, vector<1x8x144xf32>,
    return
  }
  func.func @transform_0(%arg0: i32, %arg1: i32) -> (i32, i32) {
    %c0_i32 = arith.constant 0 : i32
    %c0_i32_0 = arith.constant 0 : i32
    %c0_i32_1 = arith.constant 0 : i32
    return %c0_i32, %c0_i32_0 : i32, i32
  }
  func.func @transform_1(%arg0: i32, %arg1: i32) -> (i32, i32, i32) {
    %c0_i32 = arith.constant 0 : i32
    %c0_i32_0 = arith.constant 0 : i32
    return %arg0, %c0_i32, %arg1 : i32, i32, i32
  }
  func.func @transform_2(%arg0: i32, %arg1: i32) -> (i32, i32) {
    %c0_i32 = arith.constant 0 : i32
    %c0_i32_0 = arith.constant 0 : i32
    %c0_i32_1 = arith.constant 0 : i32
    return %c0_i32, %c0_i32_0 : i32, i32
  }
  func.func @transform_3(%arg0: i32, %arg1: i32) -> (i32, i32, i32) {
    %c0_i32 = arith.constant 0 : i32
    %c0_i32_0 = arith.constant 0 : i32
    return %arg0, %c0_i32, %arg1 : i32, i32, i32
  }
}

</mosaic_0001>

<bundles_post_ra>
// kernel: conv2d_clamp.1
= control target key start
LH: loop header
LB: loop body
LE: loop exit
PB: predicated region body
PF: predicated region fallthrough
CT: control target
= control target key end

     0   :  { %s480_s12 = smov 0   ;;  %s482_s13 = smov 0   ;;  %s519_s0 = inlined_call_operand.vmem [shape: f32[8,16], index: 0, kind: input, shape index: {}]   ;;  %s520_s1 = inlined_call_operand.vmem [shape: f32[2,16,144], index: 1, kind: input, shape index: {}]   ;;  %s521_s2 = inlined_call_operand.vmem [shape: f32[8,1], index: 2, kind: input, shape index: {}]   ;;  %s522_s3 = inlined_call_operand.vmem [shape: f32[2,8,144], index: 3, kind: output, shape index: {}]  }
   0x1   :  { %s484_s14 = smov 0  }
   0x2 LB: > { %s25_s15 = sadd.s32 1, %s452_s13  ;;  %p393_p0 = scmp.ge.s32.totalorder %s456_s14, 1  ;;  %s456_s14 = sphi %s484_s14, %s13_s14   ;;  %s452_s13 = sphi %s482_s13, %s524_s13   ;;  %s448_s12 = sphi %s480_s12, %s523_s12  }
   0x3   : > { %p27_p1 = scmp.ge.s32.totalorder %s25_s15, 2  ;;  %p158_p2 = scmp.lt.s32.totalorder %s456_s14, 3 }
   0x5   : > { %s526_s15 = smov (%p27_p1, %s25_s15), 0  ;;  %p159_p3 = pnand %p393_p0, %p158_p2 }
   0x6   : > { %p191_p4 = scmp.lt.s32.totalorder (!%p159_p3), %s448_s12, 1  ;;  %v215_v0 = vld [vmem:[%s521_s2] sm:$0xff] (!%p159_p3)  ;;  %v458_v1 = vmov (!%p159_p3), 0.0   ;;  %v459_v2 = vmov (!%p159_p3), 0   ;;  %vm221_vm0 = vcmask (!%p159_p3), 130048  }
   0x7   : > { %162 = sbr.rel (%p159_p3) target bundleno = 244 (0xf4), region = 32  ;;  %289 = vmatprep.mubr.f32.mxu0 (!%p159_p3), %v458_v1  ;;  %433 = vset.pattern.permute.xlu0 (!%p159_p3), %v459_v2  ;;  %v210_v9 = vld [vmem:[%s519_s0] sm:$0xff] (!%p159_p3) }
   0x8   : > { %218 = vperm.xlu0 (!%p159_p3), %433, %v215_v0  }
   0xe   : > { %s528_s12 = smov (!%p191_p4, %s448_s12), 1 }
   0xf   : > { %s401_s18 = sshll.u32 %s528_s12, 5  ;;  %s402_s24 = sshll.u32 %s528_s12, 4 }
  0x10   : > { %s198_s21 = scalar_lea.vmem %s520_s1, %s401_s18  ;;  %s208_s27 = scalar_lea.vmem %s522_s3, %s402_s24 }
  0x11   : > { %v212_v3 = vld [vmem:[%s198_s21 + $0x8] sm:$0xff]  ;;  %v214_v4 = vld [vmem:[%s198_s21 + $0x18] sm:$0xff]  ;;  %v211_v5 = vld [vmem:[%s198_s21] sm:$0xff] }
  0x12   : > { %v403_v6 = vpack.c.bf16 %v214_v4, %v212_v3  ;;  %v213_v7 = vld [vmem:[%s198_s21 + $0x10] sm:$0xff] }
  0x13   : > { %v405_v8 = vpack.c.bf16 %v213_v7, %v211_v5 }
  0x14   : > { %404 = vmatprep.subr.bf16.mxu0 %v403_v6 }
  0x15   : > { %406 = vmatpush1.bf16.msra.mxu0 %v405_v8 }
  0x18   : > { %398 = vmatmul.mubr.msk.f32.vlgmr.msra.gmra.mrb[0].mxu0 %vm221_vm0, %v210_v9 }
  0x87   : > { %v219_v10 = vpop.permute.xlu0 %218 }
  0xeb   : > { %v291_v11 = vpop.f32.mrb[0].mxu0 }
  0xec   : > { %v292_v12 = vadd.f32 %v291_v11, %v219_v10  ;;  %v293_v13 = vpop.f32.mrb[1].mxu0 }
  0xed   : > { %v294_v14 = vadd.f32 %v293_v13, %v219_v10 }
  0xee   : > { %v296_v15 = vmax.f32 %v292_v12, 0.0 }
  0xef   : > { %v297_v16 = vmax.f32 %v294_v14, 0.0 }
  0xf0   : > { %v298_v17 = vmin.f32 %v296_v15, 0.9 }
  0xf1   : > { %v299_v18 = vmin.f32 %v297_v16, 0.9 }
  0xf2   : > { %300 = vst [vmem:[%s208_s27] sm:$0xff] %v298_v17 }
  0xf3   : > { %301 = vst.msk [vmem:[%s208_s27 + $0x8] sm:$0xff] %vm221_vm0, %v299_v18 }
  0xf4 PF: > { %s13_s14 = sadd.s32 1, %s456_s14   ;;  %s523_s12 = smov %s452_s13 }
  0xf5   : > { %p10_p5 = scmp.ge.s32.totalorder %s13_s14, 4   ;;  %s524_s13 = smov %s526_s15 }
  0xf7   :  { %12 = sbr.rel (!%p10_p5) target bundleno = 2 (0x2), region = 62 }

</bundles_post_ra>
